<compile_context>
chip_gen: v7x
topology: tpu7x:2x2x1
jax: 0.10.0
libtpu: 0.0.40
codegen_flags: <defaults>
</compile_context>

<pallas_src>
import functools

import jax
import jax.numpy as jnp
from jax.experimental import pallas as pl
from jax.experimental.pallas import tpu as pltpu

EPS = 1e-10


def _softplus(x):
    # matches torch.nn.functional.softplus (beta=1, threshold=20)
    safe = jnp.minimum(x, 20.0)
    return jnp.where(x > 20.0, x, jnp.log(1.0 + jnp.exp(safe)))


def intensity_kernel(hs_ref, t_ref, slab_ref, out_ref, *, log_t, num_layers,
                     real_b):
    Bp, T, H = hs_ref.shape
    M = slab_ref.shape[1]
    L = num_layers

    # Fused last-timestep gather + in-kernel f32 cast (bf16 inputs welcome).
    hs = hs_ref[...]                                    # (Bp, T, H)
    h = hs[:, T - 1, :].astype(jnp.float32)             # (Bp, H)
    tt = t_ref[...].astype(jnp.float32)                 # (Bp, 1)
    if log_t:
        # The PyTorch module rebinds `target_time` to the log before linear1,
        # so the grad below is taken w.r.t. the transformed input.
        tt = jnp.log(tt + EPS)

    # Single packed slab layout (rows):
    #   [0 : H)                      -> W2h^T          (H, M)
    #   [H + l*M : H + (l+1)*M)      -> Wl[l]^T        (M, M) per hidden layer
    #   vbase = H + L*M, then:
    #     vbase+0 -> [w1, b1, b3, 0...], vbase+1 -> w2t (== W2[:, H]),
    #     vbase+2 -> b2, vbase+3..vbase+2+L -> bl, vbase+3+L -> W3 row.
    vbase = H + L * M
    row0 = slab_ref[vbase:vbase + 1, :]                  # (1, M)
    w1 = row0[:, 0:1]                                    # (1, 1)
    b1 = row0[:, 1:2]                                    # (1, 1)
    b3 = row0[:, 2:3]                                    # (1, 1)
    w2t = slab_ref[vbase + 1:vbase + 2, :]               # (1, M)
    b2 = slab_ref[vbase + 2:vbase + 3, :]                # (1, M)
    w3r = slab_ref[vbase + 3 + L:vbase + 4 + L, :]       # (1, M)

    # linear1: scalar affine on time; tangent d t / d time = w1.
    t = tt * w1 + b1                                     # (Bp, 1)

    # linear2 on cat([h_last, t]) == h @ W2h^T + t * w2t + b2 (cat avoided).
    w2h = slab_ref[0:H, :]                               # (H, M) pre-transposed
    pre2 = (jnp.dot(h, w2h, preferred_element_type=jnp.float32)
            + t * w2t + b2)                              # (Bp, M)
    act = jnp.tanh(pre2)
    dact = (1.0 - act * act) * (w1 * w2t)                # (Bp, M) tangent

    # Hidden layers: activation + tangent stacked -> one MXU pass per layer.
    # Bp is a multiple of 8, so the axis-0 concat stays sublane-aligned.
    both = jnp.concatenate([act, dact], axis=0)          # (2Bp, M)
    for l in range(L):
        W = slab_ref[H + l * M:H + (l + 1) * M, :]       # (M, M) pre-T
        bl = slab_ref[vbase + 3 + l:vbase + 4 + l, :]    # (1, M)
        z = jnp.dot(both, W, preferred_element_type=jnp.float32)
        new_act = jnp.tanh(z[:Bp] + bl)
        new_dact = (1.0 - new_act * new_act) * z[Bp:]
        both = jnp.concatenate([new_act, new_dact], axis=0)

    # linear3 (Linear -> Softplus) + the extra F.softplus via lane reduction.
    z3 = jnp.sum(both * w3r, axis=-1, keepdims=True)     # (2Bp, 1)
    pre3 = z3[:Bp] + b3
    dpre3 = z3[Bp:]

    # Shared-exp softplus/sigmoid tail: softplus(x)=log(1+e), sigmoid(x)=e/(1+e)
    # -- one exp per stage on the serial EUP dependency chain.
    e3 = jnp.exp(jnp.minimum(pre3, 20.0))
    inv3 = 1.0 / (1.0 + e3)
    s1 = jnp.where(pre3 > 20.0, pre3, jnp.log(1.0 + e3))
    ds1 = (e3 * inv3) * dpre3
    e1 = jnp.exp(jnp.minimum(s1, 20.0))
    inv1 = 1.0 / (1.0 + e1)
    int_lmbda = jnp.where(s1 > 20.0, s1, jnp.log(1.0 + e1))   # (Bp, 1)
    dint = (e1 * inv1) * ds1                                  # (Bp, 1)

    inv_b = 1.0 / real_b
    lmbda = dint * inv_b            # = d(int_lmbda.mean()) / d time_i
    log_lmbda = jnp.log(lmbda + EPS)

    # Masked means over the real batch rows (padding rows ignored).
    rowmask = jax.lax.broadcasted_iota(jnp.int32, (Bp, 1), 0) < real_b
    int_mean = jnp.sum(jnp.where(rowmask, int_lmbda, 0.0), keepdims=True) * inv_b
    log_mean = jnp.sum(jnp.where(rowmask, log_lmbda, 0.0), keepdims=True) * inv_b
    # mean_first=True and mean_first=False are analytically identical here.
    nll = int_mean - log_mean

    # Single lane-dense output slab: col 0 = lmbda, row 0 cols 1..3 = scalars.
    col = jax.lax.broadcasted_iota(jnp.int32, out_ref.shape, 1)
    row = jax.lax.broadcasted_iota(jnp.int32, out_ref.shape, 0)
    res = jnp.where(col == 0, lmbda, 0.0)
    res = jnp.where((row == 0) & (col == 1), nll, res)
    res = jnp.where((row == 0) & (col == 2), log_mean, res)
    res = jnp.where((row == 0) & (col == 3), int_mean, res)
    out_ref[...] = res


def pack_params(params):
    """One-time preprocessing: EPS-clamp (as the module's forward does),
    transpose, and pack ALL parameters into a single VMEM-friendly slab.
    Returns (slab, num_hidden_layers). Re-run after any parameter update."""
    p = jax.tree_util.tree_map(
        lambda q: jnp.maximum(jnp.asarray(q, jnp.float32), EPS), params)
    M, hp1 = p["W2"].shape
    H = hp1 - 1
    L = int(p["Wl"].shape[0])

    # Matrix rows: [W2h^T (H); Wl[0]^T (M); ...; Wl[L-1]^T (M)].
    mats = [p["W2"][:, :H].T] + [p["Wl"][l].T for l in range(L)]

    # Vector rows: scalars + bias/weight rows, padded to a multiple of 8.
    row0 = jnp.zeros((M,), jnp.float32)
    row0 = row0.at[0].set(p["w1"].reshape(()))
    row0 = row0.at[1].set(p["b1"].reshape(()))
    row0 = row0.at[2].set(p["b3"].reshape(()))
    vrows = [row0, p["W2"][:, H], p["b2"]]
    vrows += [p["bl"][l] for l in range(L)]
    vrows += [p["W3"].reshape(M)]
    vec = jnp.stack(vrows, axis=0)
    pad = (-vec.shape[0]) % 8
    if pad:
        vec = jnp.concatenate([vec, jnp.zeros((pad, M), jnp.float32)], axis=0)

    slab = jnp.concatenate(mats + [vec], axis=0)    # (H + L*M + 8k, M)
    return slab, L


@functools.partial(jax.jit,
                   static_argnames=("num_layers", "log_t", "mean_first"))
def intensity_net(slab, hidden_state, target_time, *, num_layers,
                  log_t=False, mean_first=True):
    """Forward pass of IntensityNet. Returns [nll, log_lmbda_mean,
    int_lmbda_mean, lmbda] like the PyTorch module."""
    del mean_first  # both branches give the same value (see kernel comment)
    B, T, H = hidden_state.shape
    Bp = ((B + 7) // 8) * 8          # keep the (2B, M) stack sublane-aligned

    tt = target_time.reshape(B, 1)
    if Bp != B:
        hidden_state = jnp.concatenate(
            [hidden_state, jnp.zeros((Bp - B, T, H), hidden_state.dtype)],
            axis=0)
        tt = jnp.concatenate([tt, jnp.ones((Bp - B, 1), tt.dtype)], axis=0)

    # TODO(synk): if this head is invoked many times per step, stack the calls
    # and add a leading grid axis (marked "parallel" for v7x's 2 TCs) instead
    # of one pallas_call per invocation; single-call demo stays gridless.
    vmem = pl.BlockSpec(memory_space=pltpu.MemorySpace.VMEM)
    out = pl.pallas_call(
        functools.partial(intensity_kernel, log_t=log_t,
                          num_layers=num_layers, real_b=B),
        out_shape=jax.ShapeDtypeStruct((Bp, 128), jnp.float32),
        in_specs=[vmem, vmem, vmem],
        out_specs=vmem,
    )(hidden_state, tt, slab)

    scal = out[0, 1:4]
    return [scal[0], scal[1], scal[2], out[:B, 0]]


def ref_forward(params, hidden_state, target_time, *, log_t=False):
    """Pure-JAX reference using autodiff (mirrors the PyTorch semantics)."""
    p = jax.tree_util.tree_map(lambda q: jnp.maximum(q, EPS), params)
    h = hidden_state[:, -1, :].astype(jnp.float32)
    tt = target_time.astype(jnp.float32)
    if log_t:
        tt = jnp.log(tt + EPS)

    def int_fn(tt_):
        t = tt_[:, None] @ p["w1"].T + p["b1"]
        z = jnp.concatenate([h, t], axis=-1)
        out = jnp.tanh(z @ p["W2"].T + p["b2"])
        for l in range(p["Wl"].shape[0]):
            out = jnp.tanh(out @ p["Wl"][l].T + p["bl"][l])
        pre3 = out @ p["W3"].T + p["b3"]
        return _softplus(_softplus(pre3))

    int_lmbda = int_fn(tt)
    int_mean = int_lmbda.mean()
    lmbda = jax.grad(lambda x: int_fn(x).mean())(tt)
    log_lmbda = jnp.log(lmbda + EPS)
    log_mean = log_lmbda.mean()
    nll = int_mean - log_mean
    return [nll, log_mean, int_mean, lmbda]


def _init_linear(key, out_f, in_f):
    kw, kb = jax.random.split(key)
    bound = 1.0 / (in_f ** 0.5)
    W = jax.random.uniform(kw, (out_f, in_f), jnp.float32, -bound, bound)
    b = jax.random.uniform(kb, (out_f,), jnp.float32, -bound, bound)
    # init_weights_positive(): abs + clamp(min=eps)
    return jnp.maximum(jnp.abs(W), EPS), jnp.maximum(jnp.abs(b), EPS)


if __name__ == "__main__":
    # config: hid_dim=32, mlp_dim=32, mlp_layer=3, mean_first=True, log_t=False
    B, T, HID, MLP, MLP_LAYER = 8, 8, 32, 32, 3

    key = jax.random.PRNGKey(0)
    k1, k2, k3, k4, kh, kt = jax.random.split(key, 6)

    w1, b1 = _init_linear(k1, 1, 1)
    W2, b2 = _init_linear(k2, MLP, HID + 1)
    layer_keys = jax.random.split(k3, MLP_LAYER - 1)
    Wl = jnp.stack([_init_linear(k, MLP, MLP)[0] for k in layer_keys])
    bl = jnp.stack([_init_linear(k, MLP, MLP)[1] for k in layer_keys])
    W3, b3 = _init_linear(k4, 1, MLP)

    params = {"w1": w1, "b1": b1, "W2": W2, "b2": b2,
              "Wl": Wl, "bl": bl, "W3": W3, "b3": b3}

    hidden_state = jax.random.normal(kh, (B, T, HID), jnp.float32)
    target_time = jax.random.uniform(kt, (B,), jnp.float32, 0.1, 2.0)

    slab, n_layers = pack_params(params)       # one-time prep
    slab = jax.block_until_ready(slab)

    outs = intensity_net(slab, hidden_state, target_time,
                         num_layers=n_layers, log_t=False, mean_first=True)
    outs = jax.block_until_ready(outs)

    refs = ref_forward(params, hidden_state, target_time, log_t=False)

    import numpy as np
    np.testing.assert_allclose(np.asarray(outs[0]), np.asarray(refs[0]),
                               rtol=1e-4, atol=1e-5)   # nll
    np.testing.assert_allclose(np.asarray(outs[1]), np.asarray(refs[1]),
                               rtol=1e-4, atol=1e-5)   # log_lmbda_mean
    np.testing.assert_allclose(np.asarray(outs[2]), np.asarray(refs[2]),
                               rtol=1e-4, atol=1e-5)   # int_lmbda_mean
    np.testing.assert_allclose(np.asarray(outs[3]), np.asarray(refs[3]),
                               rtol=1e-4, atol=1e-6)   # lmbda
    print("KERNEL_OK")
</pallas_src>

<mosaic_0001>
module attributes {stable_mosaic.version = 11 : i64} {
  func.func @intensity_kernel(%arg0: memref<8x8x32xf32, #tpu.memory_space<vmem>>, %arg1: memref<8x1xf32, #tpu.memory_space<vmem>>, %arg2: memref<104x32xf32, #tpu.memory_space<vmem>>, %arg3: memref<8x128xf32, #tpu.memory_space<vmem>>) attributes {dimension_semantics = [], scalar_prefetch = 0 : i64, scratch_operands = 0 : i64, tpu.core_type = #tpu.core_type<tc>} {
    %c0 = arith.constant 0 : index
    %c0_0 = arith.constant 0 : index
    %c0_1 = arith.constant 0 : index
    %0 = vector.load %arg0[%c0, %c0_0, %c0_1] : memref<8x8x32xf32, #tpu.memory_space<vmem>>, vector<8x8x32xf32>
    %1 = vector.extract_strided_slice %0 {offsets = [0, 7, 0], sizes = [8, 1, 32], strides = [1, 1, 1]} : vector<8x8x32xf32> to vector<8x1x32xf32>
    %2 = vector.shape_cast %1 : vector<8x1x32xf32> to vector<8x32xf32>
    %c0_2 = arith.constant 0 : index
    %c0_3 = arith.constant 0 : index
    %3 = vector.load %arg1[%c0_2, %c0_3] : memref<8x1xf32, #tpu.memory_space<vmem>>, vector<8x1xf32>
    %c96 = arith.constant 96 : index
    %c0_4 = arith.constant 0 : index
    %4 = vector.load %arg2[%c96, %c0_4] : memref<104x32xf32, #tpu.memory_space<vmem>>, vector<1x32xf32>
    %5 = vector.extract_strided_slice %4 {offsets = [0, 0], sizes = [1, 1], strides = [1, 1]} : vector<1x32xf32> to vector<1x1xf32>
    %6 = vector.extract_strided_slice %4 {offsets = [0, 1], sizes = [1, 1], strides = [1, 1]} : vector<1x32xf32> to vector<1x1xf32>
    %7 = vector.extract_strided_slice %4 {offsets = [0, 2], sizes = [1, 1], strides = [1, 1]} : vector<1x32xf32> to vector<1x1xf32>
    %c97 = arith.constant 97 : index
    %c0_5 = arith.constant 0 : index
    %8 = vector.load %arg2[%c97, %c0_5] : memref<104x32xf32, #tpu.memory_space<vmem>>, vector<1x32xf32>
    %c98 = arith.constant 98 : index
    %c0_6 = arith.constant 0 : index
    %9 = vector.load %arg2[%c98, %c0_6] : memref<104x32xf32, #tpu.memory_space<vmem>>, vector<1x32xf32>
    %c101 = arith.constant 101 : index
    %c0_7 = arith.constant 0 : index
    %10 = vector.load %arg2[%c101, %c0_7] : memref<104x32xf32, #tpu.memory_space<vmem>>, vector<1x32xf32>
    %11 = vector.broadcast %5 : vector<1x1xf32> to vector<8x1xf32>
    %12 = arith.mulf %3, %11 : vector<8x1xf32>
    %13 = vector.broadcast %6 : vector<1x1xf32> to vector<8x1xf32>
    %14 = arith.addf %12, %13 : vector<8x1xf32>
    %c0_8 = arith.constant 0 : index
    %c0_9 = arith.constant 0 : index
    %15 = vector.load %arg2[%c0_8, %c0_9] : memref<104x32xf32, #tpu.memory_space<vmem>>, vector<32x32xf32>
    %cst = arith.constant dense<0.000000e+00> : vector<8x32xf32>
    %16 = tpu.matmul %2, %15, %cst {dimension_numbers = #tpu.dot_dimension_numbers<[1], [0], [0], [1], [0, 0, 1, 1], [], []>} : vector<8x32xf32>, vector<32x32xf32>, vector<8x32xf32> -> vector<8x32xf32>
    %17 = vector.broadcast %14 : vector<8x1xf32> to vector<8x32xf32>
    %18 = vector.broadcast %8 : vector<1x32xf32> to vector<8x32xf32>
    %19 = arith.mulf %17, %18 : vector<8x32xf32>
    %20 = arith.addf %16, %19 : vector<8x32xf32>
    %21 = vector.broadcast %9 : vector<1x32xf32> to vector<8x32xf32>
    %22 = arith.addf %20, %21 : vector<8x32xf32>
    %23 = math.tanh %22 : vector<8x32xf32>
    %24 = arith.mulf %23, %23 : vector<8x32xf32>
    %cst_10 = arith.constant 1.000000e+00 : f32
    %25 = vector.broadcast %cst_10 : f32 to vector<8x32xf32>
    %26 = arith.subf %25, %24 : vector<8x32xf32>
    %27 = vector.broadcast %5 : vector<1x1xf32> to vector<1x32xf32>
    %28 = arith.mulf %27, %8 : vector<1x32xf32>
    %29 = vector.broadcast %28 : vector<1x32xf32> to vector<8x32xf32>
    %30 = arith.mulf %26, %29 : vector<8x32xf32>
    %31 = tpu.concatenate %23, %30 in 0 : vector<8x32xf32>, vector<8x32xf32> -> vector<16x32xf32>
    %c32 = arith.constant 32 : index
    %c0_11 = arith.constant 0 : index
    %32 = vector.load %arg2[%c32, %c0_11] : memref<104x32xf32, #tpu.memory_space<vmem>>, vector<32x32xf32>
    %c99 = arith.constant 99 : index
    %c0_12 = arith.constant 0 : index
    %33 = vector.load %arg2[%c99, %c0_12] : memref<104x32xf32, #tpu.memory_space<vmem>>, vector<1x32xf32>
    %cst_13 = arith.constant dense<0.000000e+00> : vector<16x32xf32>
    %34 = tpu.matmul %31, %32, %cst_13 {dimension_numbers = #tpu.dot_dimension_numbers<[1], [0], [0], [1], [0, 0, 1, 1], [], []>} : vector<16x32xf32>, vector<32x32xf32>, vector<16x32xf32> -> vector<16x32xf32>
    %35 = vector.extract_strided_slice %34 {offsets = [0, 0], sizes = [8, 32], strides = [1, 1]} : vector<16x32xf32> to vector<8x32xf32>
    %36 = vector.broadcast %33 : vector<1x32xf32> to vector<8x32xf32>
    %37 = arith.addf %35, %36 : vector<8x32xf32>
    %38 = math.tanh %37 : vector<8x32xf32>
    %39 = arith.mulf %38, %38 : vector<8x32xf32>
    %cst_14 = arith.constant 1.000000e+00 : f32
    %40 = vector.broadcast %cst_14 : f32 to vector<8x32xf32>
    %41 = arith.subf %40, %39 : vector<8x32xf32>
    %42 = vector.extract_strided_slice %34 {offsets = [8, 0], sizes = [8, 32], strides = [1, 1]} : vector<16x32xf32> to vector<8x32xf32>
    %43 = arith.mulf %41, %42 : vector<8x32xf32>
    %44 = tpu.concatenate %38, %43 in 0 : vector<8x32xf32>, vector<8x32xf32> -> vector<16x32xf32>
    %c64 = arith.constant 64 : index
    %c0_15 = arith.constant 0 : index
    %45 = vector.load %arg2[%c64, %c0_15] : memref<104x32xf32, #tpu.memory_space<vmem>>, vector<32x32xf32>
    %c100 = arith.constant 100 : index
    %c0_16 = arith.constant 0 : index
    %46 = vector.load %arg2[%c100, %c0_16] : memref<104x32xf32, #tpu.memory_space<vmem>>, vector<1x32xf32>
    %cst_17 = arith.constant dense<0.000000e+00> : vector<16x32xf32>
    %47 = tpu.matmul %44, %45, %cst_17 {dimension_numbers = #tpu.dot_dimension_numbers<[1], [0], [0], [1], [0, 0, 1, 1], [], []>} : vector<16x32xf32>, vector<32x32xf32>, vector<16x32xf32> -> vector<16x32xf32>
    %48 = vector.extract_strided_slice %47 {offsets = [0, 0], sizes = [8, 32], strides = [1, 1]} : vector<16x32xf32> to vector<8x32xf32>
    %49 = vector.broadcast %46 : vector<1x32xf32> to vector<8x32xf32>
    %50 = arith.addf %48, %49 : vector<8x32xf32>
    %51 = math.tanh %50 : vector<8x32xf32>
    %52 = arith.mulf %51, %51 : vector<8x32xf32>
    %cst_18 = arith.constant 1.000000e+00 : f32
    %53 = vector.broadcast %cst_18 : f32 to vector<8x32xf32>
    %54 = arith.subf %53, %52 : vector<8x32xf32>
    %55 = vector.extract_strided_slice %47 {offsets = [8, 0], sizes = [8, 32], strides = [1, 1]} : vector<16x32xf32> to vector<8x32xf32>
    %56 = arith.mulf %54, %55 : vector<8x32xf32>
    %57 = tpu.concatenate %51, %56 in 0 : vector<8x32xf32>, vector<8x32xf32> -> vector<16x32xf32>
    %58 = vector.broadcast %10 : vector<1x32xf32> to vector<16x32xf32>
    %59 = arith.mulf %57, %58 : vector<16x32xf32>
    %cst_19 = arith.constant dense<0.000000e+00> : vector<16xf32>
    %60 = vector.multi_reduction <add>, %59, %cst_19 [1] : vector<16x32xf32> to vector<16xf32>
    %61 = vector.shape_cast %60 : vector<16xf32> to vector<16x1xf32>
    %62 = vector.extract_strided_slice %61 {offsets = [0, 0], sizes = [8, 1], strides = [1, 1]} : vector<16x1xf32> to vector<8x1xf32>
    %63 = vector.broadcast %7 : vector<1x1xf32> to vector<8x1xf32>
    %64 = arith.addf %62, %63 : vector<8x1xf32>
    %65 = vector.extract_strided_slice %61 {offsets = [8, 0], sizes = [8, 1], strides = [1, 1]} : vector<16x1xf32> to vector<8x1xf32>
    %cst_20 = arith.constant 2.000000e+01 : f32
    %66 = vector.broadcast %cst_20 : f32 to vector<8x1xf32>
    %67 = arith.minimumf %64, %66 : vector<8x1xf32>
    %68 = math.exp %67 : vector<8x1xf32>
    %cst_21 = arith.constant 1.000000e+00 : f32
    %69 = vector.broadcast %cst_21 : f32 to vector<8x1xf32>
    %70 = arith.addf %69, %68 : vector<8x1xf32>
    %cst_22 = arith.constant 1.000000e+00 : f32
    %71 = vector.broadcast %cst_22 : f32 to vector<8x1xf32>
    %72 = arith.divf %71, %70 : vector<8x1xf32>
    %cst_23 = arith.constant 2.000000e+01 : f32
    %73 = vector.broadcast %cst_23 : f32 to vector<8x1xf32>
    %74 = arith.cmpf ogt, %64, %73 : vector<8x1xf32>
    %cst_24 = arith.constant 1.000000e+00 : f32
    %75 = vector.broadcast %cst_24 : f32 to vector<8x1xf32>
    %76 = arith.addf %75, %68 : vector<8x1xf32>
    %77 = math.log %76 : vector<8x1xf32>
    %78 = arith.select %74, %64, %77 : vector<8x1xi1>, vector<8x1xf32>
    %79 = arith.mulf %68, %72 : vector<8x1xf32>
    %80 = arith.mulf %79, %65 : vector<8x1xf32>
    %cst_25 = arith.constant 2.000000e+01 : f32
    %81 = vector.broadcast %cst_25 : f32 to vector<8x1xf32>
    %82 = arith.minimumf %78, %81 : vector<8x1xf32>
    %83 = math.exp %82 : vector<8x1xf32>
    %cst_26 = arith.constant 1.000000e+00 : f32
    %84 = vector.broadcast %cst_26 : f32 to vector<8x1xf32>
    %85 = arith.addf %84, %83 : vector<8x1xf32>
    %cst_27 = arith.constant 1.000000e+00 : f32
    %86 = vector.broadcast %cst_27 : f32 to vector<8x1xf32>
    %87 = arith.divf %86, %85 : vector<8x1xf32>
    %cst_28 = arith.constant 2.000000e+01 : f32
    %88 = vector.broadcast %cst_28 : f32 to vector<8x1xf32>
    %89 = arith.cmpf ogt, %78, %88 : vector<8x1xf32>
    %cst_29 = arith.constant 1.000000e+00 : f32
    %90 = vector.broadcast %cst_29 : f32 to vector<8x1xf32>
    %91 = arith.addf %90, %83 : vector<8x1xf32>
    %92 = math.log %91 : vector<8x1xf32>
    %93 = arith.select %89, %78, %92 : vector<8x1xi1>, vector<8x1xf32>
    %94 = arith.mulf %83, %87 : vector<8x1xf32>
    %95 = arith.mulf %94, %80 : vector<8x1xf32>
    %cst_30 = arith.constant 1.250000e-01 : f32
    %96 = vector.broadcast %cst_30 : f32 to vector<8x1xf32>
    %97 = arith.mulf %95, %96 : vector<8x1xf32>
    %cst_31 = arith.constant 1.000000e-10 : f32
    %98 = vector.broadcast %cst_31 : f32 to vector<8x1xf32>
    %99 = arith.addf %97, %98 : vector<8x1xf32>
    %100 = math.log %99 : vector<8x1xf32>
    %101 = tpu.iota {dimensions = array<i32: 0>} : vector<8x1xi32>
    %c8_i32 = arith.constant 8 : i32
    %102 = vector.broadcast %c8_i32 : i32 to vector<8x1xi32>
    %103 = arith.cmpi slt, %101, %102 : vector<8x1xi32>
    %cst_32 = arith.constant 0.000000e+00 : f32
    %104 = vector.broadcast %cst_32 : f32 to vector<8x1xf32>
    %105 = arith.select %103, %93, %104 : vector<8x1xi1>, vector<8x1xf32>
    %106 = vector.shape_cast %105 : vector<8x1xf32> to vector<1x8x1xf32>
    %cst_33 = arith.constant dense<0.000000e+00> : vector<1xf32>
    %107 = vector.multi_reduction <add>, %106, %cst_33 [1, 2] : vector<1x8x1xf32> to vector<1xf32>
    %108 = vector.shape_cast %107 : vector<1xf32> to vector<1x1x1xf32>
    %109 = vector.extract %108[0, 0, 0] : f32 from vector<1x1x1xf32>
    %110 = vector.broadcast %109 : f32 to vector<1x1xf32>
    %cst_34 = arith.constant 1.250000e-01 : f32
    %111 = vector.broadcast %cst_34 : f32 to vector<1x1xf32>
    %112 = arith.mulf %110, %111 : vector<1x1xf32>
    %cst_35 = arith.constant 0.000000e+00 : f32
    %113 = vector.broadcast %cst_35 : f32 to vector<8x1xf32>
    %114 = arith.select %103, %100, %113 : vector<8x1xi1>, vector<8x1xf32>
    %115 = vector.shape_cast %114 : vector<8x1xf32> to vector<1x8x1xf32>
    %cst_36 = arith.constant dense<0.000000e+00> : vector<1xf32>
    %116 = vector.multi_reduction <add>, %115, %cst_36 [1, 2] : vector<1x8x1xf32> to vector<1xf32>
    %117 = vector.shape_cast %116 : vector<1xf32> to vector<1x1x1xf32>
    %118 = vector.extract %117[0, 0, 0] : f32 from vector<1x1x1xf32>
    %119 = vector.broadcast %118 : f32 to vector<1x1xf32>
    %cst_37 = arith.constant 1.250000e-01 : f32
    %120 = vector.broadcast %cst_37 : f32 to vector<1x1xf32>
    %121 = arith.mulf %119, %120 : vector<1x1xf32>
    %122 = arith.subf %112, %121 : vector<1x1xf32>
    %123 = tpu.iota {dimensions = array<i32: 1>} : vector<8x128xi32>
    %124 = tpu.iota {dimensions = array<i32: 0>} : vector<8x128xi32>
    %c0_i32 = arith.constant 0 : i32
    %125 = vector.broadcast %c0_i32 : i32 to vector<8x128xi32>
    %126 = arith.cmpi eq, %123, %125 : vector<8x128xi32>
    %cst_38 = arith.constant 0.000000e+00 : f32
    %127 = vector.shape_cast %97 : vector<8x1xf32> to vector<8x1xf32>
    %128 = vector.broadcast %127 : vector<8x1xf32> to vector<8x128xf32>
    %129 = vector.broadcast %cst_38 : f32 to vector<8x128xf32>
    %130 = arith.select %126, %128, %129 : vector<8x128xi1>, vector<8x128xf32>
    %c0_i32_39 = arith.constant 0 : i32
    %131 = vector.broadcast %c0_i32_39 : i32 to vector<8x128xi32>
    %132 = arith.cmpi eq, %124, %131 : vector<8x128xi32>
    %c1_i32 = arith.constant 1 : i32
    %133 = vector.broadcast %c1_i32 : i32 to vector<8x128xi32>
    %134 = arith.cmpi eq, %123, %133 : vector<8x128xi32>
    %135 = arith.andi %132, %134 : vector<8x128xi1>
    %136 = vector.shape_cast %122 : vector<1x1xf32> to vector<1x1xf32>
    %137 = vector.broadcast %136 : vector<1x1xf32> to vector<8x128xf32>
    %138 = arith.select %135, %137, %130 : vector<8x128xi1>, vector<8x128xf32>
    %c0_i32_40 = arith.constant 0 : i32
    %139 = vector.broadcast %c0_i32_40 : i32 to vector<8x128xi32>
    %140 = arith.cmpi eq, %124, %139 : vector<8x128xi32>
    %c2_i32 = arith.constant 2 : i32
    %141 = vector.broadcast %c2_i32 : i32 to vector<8x128xi32>
    %142 = arith.cmpi eq, %123, %141 : vector<8x128xi32>
    %143 = arith.andi %140, %142 : vector<8x128xi1>
    %144 = vector.shape_cast %121 : vector<1x1xf32> to vector<1x1xf32>
    %145 = vector.broadcast %144 : vector<1x1xf32> to vector<8x128xf32>
    %146 = arith.select %143, %145, %138 : vector<8x128xi1>, vector<8x128xf32>
    %c0_i32_41 = arith.constant 0 : i32
    %147 = vector.broadcast %c0_i32_41 : i32 to vector<8x128xi32>
    %148 = arith.cmpi eq, %124, %147 : vector<8x128xi32>
    %c3_i32 = arith.constant 3 : i32
    %149 = vector.broadcast %c3_i32 : i32 to vector<8x128xi32>
    %150 = arith.cmpi eq, %123, %149 : vector<8x128xi32>
    %151 = arith.andi %148, %150 : vector<8x128xi1>
    %152 = vector.shape_cast %112 : vector<1x1xf32> to vector<1x1xf32>
    %153 = vector.broadcast %152 : vector<1x1xf32> to vector<8x128xf32>
    %154 = arith.select %151, %153, %146 : vector<8x128xi1>, vector<8x128xf32>
    %c0_42 = arith.constant 0 : index
    %c0_43 = arith.constant 0 : index
    %155 = vector.load %arg3[%c0_42, %c0_43] : memref<8x128xf32, #tpu.memory_space<vmem>>, vector<8x128xf32>
    tpu.vector_store %arg3[%c0_42, %c0_43], %154 {strides = array<i32>} : memref<8x128xf32, #tpu.memory_space<vmem>>, vector<8x128xf32>,
    return
  }
}

</mosaic_0001>

<bundles_post_ra>
// kernel: intensity_net.1
= control target key start
LH: loop header
LB: loop body
LE: loop exit
PB: predicated region body
PF: predicated region fallthrough
CT: control target
= control target key end

     0   :  { %v27_v0 = vlaneseq  ;;  %v582_v2 = vmov 0.0|0.0   ;;  %vm583_vm0 = vmmov 0   ;;  %v584_v5 = vmov 0.0   ;;  %s585_s9 = smov 127   ;;  %s717_s2 = inlined_call_operand.vmem [shape: f32[104,32], index: 2, kind: input, shape index: {}]   ;;  %s718_s0 = inlined_call_operand.vmem [shape: f32[8,8,32], index: 0, kind: input, shape index: {}]   ;;  %s719_s1 = inlined_call_operand.vmem [shape: f32[8,1], index: 1, kind: input, shape index: {}]   ;;  %s720_s3 = inlined_call_operand.vmem [shape: f32[8,128], index: 3, kind: output, shape index: {}]  }
   0x1   :  { %v23_v1 = vld [vmem:[%s717_s2 + $0x60] sm:$0x1]  ;;  %525 = vmatprep.subr.bf16.mxu0 %v582_v2  ;;  %v38_v4 = vld [vmem:[%s717_s2 + $0x8] sm:$0xff]  ;;  %500 = vmatprep.mubr.msk.f32.mxu0 %vm583_vm0, %v584_v5  ;;  %v39_v8 = vld [vmem:[%s717_s2 + $0x10] sm:$0xff]  ;;  %vm61_vm1 = vcmask 1041409   ;;  %vm64_vm2 = vcmask 1042434  }
   0x2   :  { %v37_v3 = vld [vmem:[%s717_s2] sm:$0xff]  ;;  %v619_v6 = vshrl.u32 %v27_v0, 7  ;;  %v40_v9 = vld [vmem:[%s717_s2 + $0x18] sm:$0xff]  ;;  %v15_v11 = vld [vmem:[%s718_s0 + $0x8] sm:$0xff]  ;;  %vm67_vm3 = vcmask 1043459   ;;  %vm70_vm4 = vcmask 1044484  }
   0x3   :  { %v526_v7 = vpack.c.bf16 %v38_v4, %v37_v3  ;;  %v14_v10 = vld [vmem:[%s718_s0] sm:$0xff]  ;;  %v16_v12 = vld [vmem:[%s718_s0 + $0x10] sm:$0xff]  ;;  %v17_v13 = vld [vmem:[%s718_s0 + $0x18] sm:$0xff]  ;;  %v529_v16 = vpack.c.bf16 %v40_v9, %v39_v8  ;;  %v60_v20 = vrot.slane %v15_v11, 6  ;;  %vm73_vm5 = vcmask 1045509  }
   0x4   :  { %v59_v14 = vrot.slane %v14_v10, 7  ;;  %v640_v15 = vsub.s32 0, %v619_v6  ;;  %v18_v17 = vld [vmem:[%s718_s0 + $0x20] sm:$0xff]  ;;  %v19_v18 = vld [vmem:[%s718_s0 + $0x28] sm:$0xff]  ;;  %v20_v19 = vld [vmem:[%s718_s0 + $0x30] sm:$0xff]  ;;  %v63_v21 = vrot.slane %v16_v12, 5 }
   0x5   :  { %527 = vmatpush3.bf16.msra.mxu0 %v526_v7  ;;  %v66_v22 = vrot.slane %v17_v13, 4  ;;  %v69_v23 = vrot.slane %v18_v17, 3  ;;  %v72_v26 = vrot.slane %v19_v18, 2  ;;  %v75_v28 = vrot.slane %v20_v19, 1  ;;  %v21_v30 = vld [vmem:[%s718_s0 + $0x38] sm:$0xff]  ;;  %v22_v36 = vld [vmem:[%s719_s1] sm:$0xff] }
   0x6   :  { %528 = vmatprep.subr.bf16.mxu0 %v582_v2  ;;  %v652_v24 = vrot.slane %v23_v1, %v640_v15  ;;  %v62_v25 = vsel %vm61_vm1, %v60_v20, %v59_v14  ;;  %vm76_vm6 = vcmask 1046534   ;;  %vm78_vm7 = vcmask 1047559   ;;  %v172_v40 = vld [vmem:[%s717_s2 + $0x20] sm:$0xff]  ;;  %v173_v41 = vld [vmem:[%s717_s2 + $0x28] sm:$0xff]  ;;  %v174_v43 = vld [vmem:[%s717_s2 + $0x30] sm:$0xff] }
   0x7   :  { %v65_v27 = vsel %vm64_vm2, %v63_v21, %v62_v25  ;;  %v586_v32 = vmov 0   ;;  %vm80_vm8 = vcmask 261120   ;;  %v531_v42 = vpack.c.bf16 %v173_v41, %v172_v40  ;;  %v175_v44 = vld [vmem:[%s717_s2 + $0x38] sm:$0xff]  ;;  %v24_v48 = vld [vmem:[%s717_s2 + $0x61] sm:$0x1]  ;;  %v268_v63 = vld [vmem:[%s717_s2 + $0x48] sm:$0xff] }
   0x8   :  { %33 = vrot.lane.b32.xlu0 %v652_v24, %s585_s9  ;;  %v68_v29 = vsel %vm67_vm3, %v66_v22, %v65_v27  ;;  %559 = vset.pattern.permute.xlu1 %v586_v32  ;;  %v31_v37 = vmul.f32 %v652_v24, %v22_v36  ;;  %v535_v45 = vpack.c.bf16 %v175_v44, %v174_v43  ;;  %v467_v52 = vld [vmem:[%s717_s2 + $0x62] ss:$0 sm:$0xff]  ;;  %v269_v2 = vld [vmem:[%s717_s2 + $0x50] sm:$0xff]  ;;  %v270_v3 = vld [vmem:[%s717_s2 + $0x58] sm:$0xff]  ;;  %vm411_vm11 = vcmask 7168  }
   0x9   :  { %530 = vmatpush3.bf16.msra.mxu0 %v529_v16  ;;  %v71_v31 = vsel %vm70_vm4, %v69_v23, %v68_v29  ;;  %558 = vset.pattern.permute.xlu0 %v586_v32  ;;  %v49_v49 = vrot.slane %v24_v48, %v640_v15  ;;  %v267_v62 = vld [vmem:[%s717_s2 + $0x40] sm:$0xff]  ;;  %v543_v4 = vpack.c.bf16 %v270_v3, %v269_v2  ;;  %vm451_vm12 = vcmp.eq.s32.totalorder %v619_v6, 0 }
   0xa   :  { %v74_v33 = vsel %vm73_vm5, %v72_v26, %v71_v31  ;;  %163 = vperm.xlu1 %559, %v23_v1   ;;  %532 = vmatprep.subr.bf16.mxu1 %v531_v42  ;;  %v539_v1 = vpack.c.bf16 %v268_v63, %v267_v62  ;;  %v470_v5 = vld [vmem:[%s717_s2 + $0x63] ss:$0 sm:$0xff]  ;;  %v473_v14 = vld [vmem:[%s717_s2 + $0x64] ss:$0 sm:$0xff]  ;;  %v474_v18 = vld [vmem:[%s717_s2 + $0x65] ss:$0 sm:$0xff] }
   0xb   :  { %v77_v34 = vsel %vm76_vm6, %v75_v28, %v74_v33  ;;  %534 = vmatpush3.bf16.msra.mxu1 %v531_v42  ;;  %s588_s2 = smov 126  }
   0xc   :  { %v79_v35 = vsel %vm78_vm7, %v21_v30, %v77_v34  ;;  %536 = vmatprep.subr.bf16.mxu1 %v535_v45  ;;  %540 = vmatprep.subr.bf16.mxu0 %v539_v1 }
   0xd   :  { %501 = vmatmul.mubr.msk.f32.vlgmr.msra.gmra.mrb[0].mxu0 %vm80_vm8, %v79_v35 }
   0xe   :  { %542 = vmatpush3.bf16.msra.mxu0 %v539_v1 }
   0xf   :  { %538 = vmatpush3.bf16.msra.mxu1 %v535_v45  ;;  %544 = vmatprep.subr.bf16.mxu0 %v543_v4 }
  0x12   :  { %546 = vmatpush3.bf16.msra.mxu0 %v543_v4 }
  0x7a   :  { %v34_v38 = vpop.permute.xlu0 %33 }
  0x7b   :  { %v36_v39 = vadd.f32 %v34_v38, %v31_v37 }
  0x7d   :  { %43 = vperm.xlu0 %558, %v36_v39  }
  0x89   :  { %v164_v55 = vpop.permute.xlu1 %163 }
  0x8a   :  { %v166_v56 = vmul.f32 %v164_v55, %v24_v48 }
  0x8c   :  { %v170_v59 = vrot.slane %v166_v56, %v640_v15 }
  0xe0   :  { %v149_v46 = vpop.f32.mrb[0].mxu0 }
  0xe1   :  { %v502_v47 = vpop.f32.mrb[1].mxu0 }
  0xfc   :  { %v44_v50 = vpop.permute.xlu0 %43 }
  0xfd   :  { %v50_v51 = vmul.f32 %v49_v49, %v44_v50 }
  0xff   :  { %v150_v53 = vadd.f32 %v149_v46, %v50_v51 }
 0x101   :  { %v157_v54 = vadd.f32 %v467_v52, %v150_v53 }
 0x103   :  { %562 = vtanh.f32 %v157_v54 }
 0x10d   :  { %v563_v57 = vpop.eup %562 }
 0x10e   :  { %v159_v58 = vmul.f32 %v563_v57, %v563_v57  ;;  %511 = vmatprep.mubr.msk.f32.mxu1 %vm80_vm8, %v563_v57 }
 0x110   :  { %v160_v60 = vsub.f32 1.0, %v159_v58 }
 0x112   :  { %v171_v61 = vmul.f32 %v170_v59, %v160_v60 }
 0x114   :  { %512 = vmatmul.mubr.msk.f32.vlgmr.msra.gmra.mrb[0].mxu1 %vm80_vm8, %v171_v61 }
 0x1e7   :  { %v513_v7 = vpop.f32.mrb[0].mxu1 }
 0x1e8   :  { %v249_v8 = vpop.f32.mrb[1].mxu1 }
 0x1e9   :  { %v262_v9 = vadd.f32 %v470_v5, %v249_v8 }
 0x1eb   :  { %564 = vtanh.f32 %v262_v9 }
 0x1f5   :  { %v565_v10 = vpop.eup %564 }
 0x1f6   :  { %v264_v11 = vmul.f32 %v565_v10, %v565_v10  ;;  %522 = vmatprep.mubr.msk.f32.mxu0 %vm80_vm8, %v565_v10 }
 0x1f8   :  { %v265_v12 = vsub.f32 1.0, %v264_v11  ;;  %v443_v11 = vand.u32 127, %v27_v0 }
 0x1fa   :  { %v266_v13 = vmul.f32 %v513_v7, %v265_v12  ;;  %vm452_vm13 = vcmp.eq.s32.totalorder %v443_v11, 1  ;;  %vm455_vm14 = vcmp.eq.s32.totalorder %v443_v11, 2  ;;  %vm444_vm15 = vcmp.eq.s32.totalorder %v443_v11, 0 }
 0x1fb   :  { %vm458_vm0 = vcmp.eq.s32.totalorder %v443_v11, 3  ;;  %vm453_vm1 = vmand %vm451_vm12, %vm452_vm13 }
 0x1fc   :  { %523 = vmatmul.mubr.msk.f32.vlgmr.msra.gmra.mrb[2].mxu0 %vm80_vm8, %v266_v13  ;;  %vm456_vm2 = vmand %vm451_vm12, %vm455_vm14 }
 0x1fd   :  { %vm459_vm3 = vmand %vm451_vm12, %vm458_vm0 }
 0x2cf   :  { %v524_v15 = vpop.f32.mrb[2].mxu0 }
 0x2d0   :  { %v344_v16 = vpop.f32.mrb[3].mxu0 }
 0x2d1   :  { %v357_v17 = vadd.f32 %v473_v14, %v344_v16 }
 0x2d3   :  { %566 = vtanh.f32 %v357_v17 }
 0x2dd   :  { %v567_v19 = vpop.eup %566 }
 0x2de   :  { %v366_v20 = vmul.f32 %v567_v19, %v474_v18  ;;  %v359_v21 = vmul.f32 %v567_v19, %v567_v19 }
 0x2e0   :  { %v368_v22 = vsel %vm80_vm8, %v366_v20, 0.0  ;;  %v360_v23 = vsub.f32 1.0, %v359_v21 }
 0x2e1   :  { %369 = vadd.xlane.f32.xlu1 %v368_v22 }
 0x2e2   :  { %v361_v25 = vmul.f32 %v524_v15, %v360_v23 }
 0x2e4   :  { %v367_v26 = vmul.f32 %v474_v18, %v361_v25 }
 0x2e6   :  { %v371_v27 = vsel %vm80_vm8, %v367_v26, 0.0 }
 0x2e7   :  { %372 = vadd.xlane.f32.xlu0 %v371_v27 }
 0x36e   :  { %v370_v28 = vpop.xlane.xlu1 %369 }
 0x36f   :  { %v374_v29 = vadd.f32 %v370_v28, %v652_v24  ;;  %v587_v24 = vmov 2  }
 0x370   :  { %560 = vset.pattern.permute.xlu1 %v587_v24  ;;  %561 = vset.pattern.permute.xlu0 %v587_v24 }
 0x371   :  { %v375_v30 = vmin.f32 %v374_v29, 20.0  ;;  %vm381_vm9 = vcmp.gt.f32.partialorder %v374_v29, 20.0 }
 0x373   :  { %v376_v31 = vmul.f32 1.442695, %v375_v30 }
 0x374   :  { %v373_v44 = vpop.xlane.xlu0 %372 }
 0x375   :  { %568 = vpow2.f32 %v376_v31 }
 0x37f   :  { %v569_v32 = vpop.eup %568 }
 0x380   :  { %v378_v33 = vadd.f32 1.0, %v569_v32 }
 0x382   :  { %570 = vlog2.f32 %v378_v33 }
 0x38c   :  { %v571_v34 = vpop.eup %570 }
 0x38d   :  { %v383_v35 = vmul.f32 0.6931472, %v571_v34 }
 0x38f   :  { %v384_v36 = vsel %vm381_vm9, %v374_v29, %v383_v35 }
 0x390   :  { %v387_v37 = vmin.f32 %v384_v36, 20.0  ;;  %vm393_vm10 = vcmp.gt.f32.partialorder %v384_v36, 20.0 }
 0x392   :  { %v388_v38 = vmul.f32 1.442695, %v387_v37 }
 0x394   :  { %572 = vpow2.f32 %v388_v38 }
 0x395   :  { %574 = vrcp.f32 %v378_v33 }
 0x39e   :  { %v573_v39 = vpop.eup %572 }
 0x39f   :  { %v390_v40 = vadd.f32 1.0, %v573_v39  ;;  %v575_v41 = vpop.eup %574 }
 0x3a0   :  { %v385_v42 = vmul.f32 %v575_v41, %v569_v32 }
 0x3a1   :  { %576 = vrcp.f32 %v390_v40 }
 0x3a2   :  { %578 = vlog2.f32 %v390_v40  ;;  %v386_v47 = vmul.f32 %v385_v42, %v373_v44 }
 0x3ab   :  { %v577_v43 = vpop.eup %576 }
 0x3ac   :  { %v579_v45 = vpop.eup %578  ;;  %v397_v46 = vmul.f32 %v577_v43, %v573_v39 }
 0x3ad   :  { %v395_v48 = vmul.f32 0.6931472, %v579_v45 }
 0x3ae   :  { %v398_v49 = vmul.f32 %v397_v46, %v386_v47 }
 0x3af   :  { %v396_v50 = vsel %vm393_vm10, %v384_v36, %v395_v48 }
 0x3b0   :  { %v399_v51 = vmul.f32 0.125, %v398_v49  ;;  %408 = vrot.lane.b32.xlu1 %v396_v50, %s588_s2 }
 0x3b2   :  { %v400_v52 = vadd.f32 1e-10, %v399_v51 }
 0x3b4   :  { %580 = vlog2.f32 %v400_v52 }
 0x3be   :  { %v581_v53 = vpop.eup %580 }
 0x3bf   :  { %v402_v54 = vmul.f32 0.6931472, %v581_v53 }
 0x3c1   :  { %426 = vrot.lane.b32.xlu0 %v402_v54, %s588_s2 }
 0x422   :  { %v409_v55 = vpop.permute.xlu1 %408 }
 0x423   :  { %v412_v56 = vsel %vm411_vm11, %v409_v55, 0.0 }
 0x424   :  { %413 = vadd.xlane.f32.xlu1 %v412_v56 }
 0x433   :  { %v427_v57 = vpop.permute.xlu0 %426 }
 0x434   :  { %v429_v58 = vsel %vm411_vm11, %v427_v57, 0.0 }
 0x435   :  { %447 = vperm.xlu1 %560, %v399_v51   ;;  %430 = vadd.xlane.f32.xlu0 %v429_v58 }
 0x4b1   :  { %v414_v59 = vpop.xlane.xlu1 %413 }
 0x4b2   :  { %v415_v60 = vrot.slane %v414_v59, 4 }
 0x4b4   :  { %v416_v61 = vadd.f32 %v415_v60, %v414_v59 }
 0x4b5   :  { %v448_v14 = vpop.permute.xlu1 %447 }
 0x4b6   :  { %v417_v62 = vrot.slane %v416_v61, 2  ;;  %v450_v18 = vsel %vm444_vm15, %v448_v14, 0.0 }
 0x4b8   :  { %v418_v63 = vadd.f32 %v417_v62, %v416_v61 }
 0x4ba   :  { %v419_v1 = vrot.slane %v418_v63, 1 }
 0x4bc   :  { %v420_v2 = vadd.f32 %v419_v1, %v418_v63 }
 0x4be   :  { %547 = vpush %v420_v2 }
 0x4c2   :  { %v431_v3 = vpop.xlane.xlu0 %430 }
 0x4c3   :  { %v432_v4 = vrot.slane %v431_v3, 4 }
 0x4c5   :  { %v433_v5 = vadd.f32 %v432_v4, %v431_v3 }
 0x4c7   :  { %v434_v7 = vrot.slane %v433_v5, 2 }
 0x4c9   :  { %v435_v8 = vadd.f32 %v434_v7, %v433_v5 }
 0x4cb   :  { %v436_v9 = vrot.slane %v435_v8, 1 }
 0x4cd   :  { %v437_v10 = vadd.f32 %v436_v9, %v435_v8 }
 0x4cf   :  { %549 = vpush %v437_v10 }
 0x4ef   :  { %s548_s11 = spop %547 }
 0x4f0   :  { %v422_v12 = vstv %s548_s11 }
 0x4f1   :  { %v423_v15 = vmul.f32 0.125, %v422_v12 }
 0x500   :  { %s550_s12 = spop %549 }
 0x501   :  { %v439_v13 = vstv %s550_s12 }
 0x502   :  { %v440_v16 = vmul.f32 0.125, %v439_v13 }
 0x504   :  { %v441_v17 = vsub.f32 %v423_v15, %v440_v16 }
 0x506   :  { %v454_v19 = vsel %vm453_vm1, %v441_v17, %v450_v18 }
 0x507   :  { %v457_v20 = vsel %vm456_vm2, %v440_v16, %v454_v19 }
 0x508   :  { %v460_v0 = vsel %vm459_vm3, %v423_v15, %v457_v20 }
 0x509   :  { %461 = vst [vmem:[%s720_s3] sm:$0xff] %v460_v0 }

</bundles_post_ra>
